<compile_context>
chip_gen: v7x
topology: tpu7x:2x2x1
jax: 0.10.0
libtpu: 0.0.40
codegen_flags: <defaults>
</compile_context>

<pallas_src>
import functools
import math

import jax
import jax.numpy as jnp
from jax import lax
from jax.experimental import pallas as pl
from jax.experimental.pallas import tpu as pltpu


def _round_up(x, m):
    return ((x + m - 1) // m) * m


# ---------------------------------------------------------------------------
# Path 1: small table resident in VMEM -- one-hot MXU gather (no per-row DMAs).
# ---------------------------------------------------------------------------
def _embedding_onehot_kernel(ids_ref, table_ref, out_ref, *, scale, vocab):
    # ids_ref   : VMEM (blk, 1) int32 token ids for this block
    # table_ref : VMEM (vocab, d_embed) full table (resident across grid steps)
    # out_ref   : VMEM (blk, d_embed)
    ids = ids_ref[...]                                                 # (blk, 1)
    iota = lax.broadcasted_iota(jnp.int32, (ids.shape[0], vocab), 1)   # (blk, vocab)
    one_hot = (ids == iota).astype(table_ref.dtype)                    # row selector
    gathered = jnp.dot(one_hot, table_ref[...],
                       preferred_element_type=jnp.float32)             # (blk, d_embed)
    out_ref[...] = (gathered * scale).astype(out_ref.dtype)


# ---------------------------------------------------------------------------
# Path 2: large table stays in HBM -- per-row DMA gather straight into out_ref.
# ---------------------------------------------------------------------------
def _embedding_hbm_gather_kernel(ids_ref, table_hbm, out_ref, sems, *,
                                 scale, blk, n_sub, n_tokens, vocab):
    # ids_ref   : SMEM (N,) int32 token ids (scalar prefetch)
    # table_hbm : HBM  (vocab, d_embed) embedding table (raw ref, no auto-DMA)
    # out_ref   : VMEM (n_sub * blk, d_embed) output tile for this grid step
    # sems      : DMA semaphores, shape (n_sub,) -- one per sub-block
    step = pl.program_id(0)
    base = step * (n_sub * blk)
    last_tok = n_tokens - 1
    last_row = vocab - 1

    def issue(sub):
        def body(t, carry):
            # Tail-safe: clamp the flat token index (the last grid step may be
            # partial); clamp the row id so a bad id can't DMA out of bounds.
            flat = jnp.minimum(base + sub * blk + t, last_tok)
            tok = jnp.minimum(jnp.maximum(ids_ref[flat], 0), last_row)
            pltpu.make_async_copy(
                table_hbm.at[pl.ds(tok, 1), :],            # (1, d_embed) HBM row
                out_ref.at[pl.ds(sub * blk + t, 1), :],    # its final output slot
                sems.at[sub],
            ).start()
            return carry
        lax.fori_loop(0, blk, body, 0, unroll=8)

    # Deep prefetch: fill the DMA queue with ALL sub-blocks' row gathers before
    # waiting on anything (ids already in SMEM, destinations are disjoint).
    for sub in range(n_sub):
        issue(sub)

    # Per sub-block: ONE aggregated wait (descriptor byte count == the blk row
    # copies issued on the same semaphore), then one dense in-place scale.
    for sub in range(n_sub):
        blk_view = out_ref.at[pl.ds(sub * blk, blk), :]
        pltpu.make_async_copy(blk_view, blk_view, sems.at[sub]).wait()
        out_ref[pl.ds(sub * blk, blk), :] = (
            out_ref[pl.ds(sub * blk, blk), :] * scale
        ).astype(out_ref.dtype)


def embedding_forward(ids, table, *, use_hbm_gather=None):
    """ids: (B, S) int -> (B, S, d_embed) with out = table[ids] * sqrt(d_embed)."""
    B, S = ids.shape
    vocab, d_embed = table.shape
    N = B * S
    scale = math.sqrt(float(d_embed))
    itemsize = jnp.dtype(table.dtype).itemsize
    row_bytes = d_embed * itemsize
    table_bytes = vocab * row_bytes
    ids = ids.astype(jnp.int32)

    if use_hbm_gather is None:
        # Small tables: keep the whole table resident in VMEM (cheapest path).
        use_hbm_gather = not (table_bytes <= (4 << 20) and vocab <= 2048)

    if not use_hbm_gather:
        # --------------------- VMEM-resident one-hot path ---------------------
        cap_by_bytes = max(8, ((1 << 20) // row_bytes) // 8 * 8)
        blk = max(8, min(256, cap_by_bytes, _round_up(N, 8)))
        num_steps = pl.cdiv(N, blk)
        vmem_needed = (2 * table_bytes + 2 * blk * row_bytes
                       + blk * vocab * (4 + itemsize) + 4 * blk)
        kernel = functools.partial(_embedding_onehot_kernel,
                                   scale=scale, vocab=vocab)
        out = pl.pallas_call(
            kernel,
            out_shape=jax.ShapeDtypeStruct((N, d_embed), table.dtype),
            grid_spec=pltpu.PrefetchScalarGridSpec(
                num_scalar_prefetch=0,
                grid=(num_steps,),
                in_specs=[
                    pl.BlockSpec((blk, 1), lambda i: (i, 0)),
                    pl.BlockSpec((vocab, d_embed), lambda i: (0, 0)),  # resident
                ],
                out_specs=pl.BlockSpec((blk, d_embed), lambda i: (i, 0)),
            ),
            compiler_params=pltpu.CompilerParams(
                dimension_semantics=("parallel",),
                vmem_limit_bytes=min(64 << 20,
                                     max(16 << 20, vmem_needed + (4 << 20))),
            ),
        )(ids.reshape(N, 1), table)
        return out.reshape(B, S, d_embed)

    # ------------------------- HBM row-gather path ----------------------------
    # ~<= 1 MiB per sub-block output tile; 8 <= blk <= 512, multiple of 8.
    blk = min(512, max(8, ((1 << 20) // row_bytes) // 8 * 8))
    n_sub = 4
    # Don't let one step swallow a small input; keep >= ~4 grid steps when
    # possible so the parallel axis still feeds both TensorCores on v7x.
    while n_sub > 1 and pl.cdiv(N, blk * n_sub) < 4:
        n_sub //= 2
    while blk > 8 and pl.cdiv(N, blk * n_sub) < 4:
        blk = max(8, (blk // 2) // 8 * 8)
    tokens_per_step = blk * n_sub
    num_steps = pl.cdiv(N, tokens_per_step)
    vmem_needed = 2 * tokens_per_step * row_bytes   # out tile, double-buffered

    kernel = functools.partial(
        _embedding_hbm_gather_kernel,
        scale=scale, blk=blk, n_sub=n_sub, n_tokens=N, vocab=vocab)

    # TODO(synk): ids live wholly in SMEM; for very long token streams chunk the
    # id prefetch per grid step instead of prefetching the full stream at once.
    # TODO(synk): for d_embed < 128 output stores are lane-masked; a lane-dense
    # variant would pack 128 // d_embed tokens per 128-lane row.
    out = pl.pallas_call(
        kernel,
        out_shape=jax.ShapeDtypeStruct((N, d_embed), table.dtype),
        grid_spec=pltpu.PrefetchScalarGridSpec(
            num_scalar_prefetch=1,                        # ids -> SMEM
            grid=(num_steps,),
            in_specs=[pl.BlockSpec(memory_space=pl.ANY)],  # table stays in HBM
            out_specs=pl.BlockSpec((tokens_per_step, d_embed),
                                   lambda i, ids: (i, 0)),
            scratch_shapes=[pltpu.SemaphoreType.DMA((n_sub,))],
        ),
        compiler_params=pltpu.CompilerParams(
            dimension_semantics=("parallel",),
            vmem_limit_bytes=min(64 << 20,
                                 max(16 << 20, vmem_needed + (4 << 20))),
        ),
    )(ids.reshape(N), table)
    return out.reshape(B, S, d_embed)


if __name__ == "__main__":
    d_embed = 32
    vocab_size = 64
    B, S = 2, 8

    key = jax.random.PRNGKey(0)
    k_tab, k_ids = jax.random.split(key)

    # nn.Embedding default init: N(0, 1)
    table = jax.random.normal(k_tab, (vocab_size, d_embed), dtype=jnp.float32)
    ids = jax.random.randint(k_ids, (B, S), 0, vocab_size, dtype=jnp.int32)

    ref = table[ids] * math.sqrt(d_embed)

    # Default dispatch: tiny table -> VMEM-resident one-hot path.
    out = jax.block_until_ready(embedding_forward(ids, table))
    assert out.shape == (B, S, d_embed)
    assert jnp.allclose(out, ref, atol=1e-5, rtol=1e-5)

    # Also exercise the large-table HBM row-gather path on the same inputs.
    out2 = jax.block_until_ready(
        embedding_forward(ids, table, use_hbm_gather=True))
    assert jnp.allclose(out2, ref, atol=1e-5, rtol=1e-5)

    print("KERNEL_OK")
</pallas_src>

<mosaic_0001>
module attributes {stable_mosaic.version = 11 : i64} {
  func.func @_embedding_onehot_kernel(%arg0: i32, %arg1: memref<16x1xi32, #tpu.memory_space<vmem>>, %arg2: memref<64x32xf32, #tpu.memory_space<vmem>>, %arg3: memref<16x32xf32, #tpu.memory_space<vmem>>) attributes {dimension_semantics = [#tpu.dimension_semantics<parallel>], iteration_bounds = array<i64: 1>, scalar_prefetch = 0 : i64, scratch_operands = 0 : i64, tpu.core_type = #tpu.core_type<tc>, window_params = [{transform_indices = @transform_0, window_bounds = array<i64: 16, 1>}, {pipeline_mode = #tpu.pipeline_mode<synchronous>, transform_indices = @transform_1, window_bounds = array<i64: 64, 32>}, {transform_indices = @transform_2, window_bounds = array<i64: 16, 32>}]} {
    %c0 = arith.constant 0 : index
    %c0_0 = arith.constant 0 : index
    %0 = vector.load %arg1[%c0, %c0_0] : memref<16x1xi32, #tpu.memory_space<vmem>>, vector<16x1xi32>
    %1 = tpu.iota {dimensions = array<i32: 1>} : vector<16x64xi32>
    %2 = vector.broadcast %0 : vector<16x1xi32> to vector<16x64xi32>
    %3 = arith.cmpi eq, %2, %1 : vector<16x64xi32>
    %4 = arith.extui %3 : vector<16x64xi1> to vector<16x64xi32>
    %5 = arith.sitofp %4 : vector<16x64xi32> to vector<16x64xf32>
    %c0_1 = arith.constant 0 : index
    %c0_2 = arith.constant 0 : index
    %6 = vector.load %arg2[%c0_1, %c0_2] : memref<64x32xf32, #tpu.memory_space<vmem>>, vector<64x32xf32>
    %cst = arith.constant dense<0.000000e+00> : vector<16x32xf32>
    %7 = tpu.matmul %5, %6, %cst {dimension_numbers = #tpu.dot_dimension_numbers<[1], [0], [0], [1], [0, 0, 1, 1], [], []>} : vector<16x64xf32>, vector<64x32xf32>, vector<16x32xf32> -> vector<16x32xf32>
    %cst_3 = arith.constant 5.65685415 : f32
    %8 = vector.broadcast %cst_3 : f32 to vector<16x32xf32>
    %9 = arith.mulf %7, %8 : vector<16x32xf32>
    %c0_4 = arith.constant 0 : index
    %c0_5 = arith.constant 0 : index
    %10 = vector.load %arg3[%c0_4, %c0_5] : memref<16x32xf32, #tpu.memory_space<vmem>>, vector<16x32xf32>
    tpu.vector_store %arg3[%c0_4, %c0_5], %9 {strides = array<i32>} : memref<16x32xf32, #tpu.memory_space<vmem>>, vector<16x32xf32>,
    return
  }
  func.func @transform_0(%arg0: i32) -> (i32, i32) {
    %c0_i32 = arith.constant 0 : i32
    %c0_i32_0 = arith.constant 0 : i32
    return %arg0, %c0_i32 : i32, i32
  }
  func.func @transform_1(%arg0: i32) -> (i32, i32) {
    %c0_i32 = arith.constant 0 : i32
    %c0_i32_0 = arith.constant 0 : i32
    %c0_i32_1 = arith.constant 0 : i32
    return %c0_i32, %c0_i32_0 : i32, i32
  }
  func.func @transform_2(%arg0: i32) -> (i32, i32) {
    %c0_i32 = arith.constant 0 : i32
    %c0_i32_0 = arith.constant 0 : i32
    return %arg0, %c0_i32 : i32, i32
  }
}

</mosaic_0001>

<bundles_post_ra>
// kernel: tpu_custom_call.1
= control target key start
LH: loop header
LB: loop body
LE: loop exit
PB: predicated region body
PF: predicated region fallthrough
CT: control target
= control target key end

     0   :  { %v218_v2 = vmov 0   ;;  %s280_s0 = inlined_call_operand.vmem [shape: s32[16,1], index: 0, kind: input, shape index: {}]   ;;  %s281_s1 = inlined_call_operand.vmem [shape: f32[64,32], index: 1, kind: input, shape index: {}]   ;;  %s282_s2 = inlined_call_operand.hbm [shape: f32[16,32], index: 2, kind: output, shape index: {}]  }
   0x1   :  { %v12_v0 = vld [vmem:[%s280_s0] sm:$0xff]  ;;  %193 = vset.pattern.permute.xlu0 %v218_v2  ;;  %v29_v3 = vld [vmem:[%s281_s1 + $0x8] sm:$0xff]  ;;  %v30_v4 = vld [vmem:[%s281_s1 + $0x10] sm:$0xff] }
   0x2   :  { %v28_v1 = vld [vmem:[%s281_s1] sm:$0xff]  ;;  %v31_v5 = vld [vmem:[%s281_s1 + $0x18] sm:$0xff]  ;;  %17 = vperm.xlu0 %193, %v12_v0   ;;  %v13_v6 = vld [vmem:[%s280_s0 + $0x8] sm:$0xff] }
   0x3   :  { %v172_v7 = vpack.c.bf16 %v29_v3, %v28_v1  ;;  %v176_v8 = vpack.c.bf16 %v31_v5, %v30_v4  ;;  %v32_v9 = vld [vmem:[%s281_s1 + $0x20] sm:$0xff]  ;;  %v33_v10 = vld [vmem:[%s281_s1 + $0x28] sm:$0xff] }
   0x4   :  { %7 = vsyncpa [#allocation3], 0  ;;  %v180_v11 = vpack.c.bf16 %v33_v10, %v32_v9  ;;  %v34_v12 = vld [vmem:[%s281_s1 + $0x30] sm:$0xff]  ;;  %v35_v13 = vld [vmem:[%s281_s1 + $0x38] sm:$0xff]  ;;  %v14_v15 = vlaneseq  ;;  %vm36_vm0 = vcmask 523264   ;;  %v219_v18 = vmov 0.0  }
   0x5   :  { %173 = vmatprep.subr.bf16.mxu0 %v172_v7  ;;  %v184_v14 = vpack.c.bf16 %v35_v13, %v34_v12  ;;  %s220_s28 = smov [#allocation2]   ;;  %vm120_vm3 = vcmask 261120  }
   0x6   :  { %175 = vmatpush3.bf16.msra.mxu0 %v172_v7  ;;  %20 = vperm.xlu0 %193, %v13_v6   ;;  %v15_v16 = vand.u32 127, %v14_v15  ;;  %s128_s1 = sshll.u32 %s220_s28, 4  ;;  %s129_s1 = int_to_ptr.vmem [resolvable:$true] %s128_s1 }
   0x7   :  { %177 = vmatprep.subr.bf16.mxu0 %v176_v8  ;;  %s194_s29 = scalar_lea.vmem %s129_s1, 256  ;;  %p199_p1 = scmp.lt.s32.totalorder %s129_s1, %s129_s1 }
   0x8   :  { %p195_p0 = scmp.ne.s32.totalorder %s129_s1, %s194_s29  ;;  %p200_p2 = scmp.lt.s32.totalorder %s194_s29, %s194_s29 }
   0xa   :  { %179 = vmatpush3.bf16.msra.mxu0 %v176_v8  ;;  %p201_p3 = por %p200_p2, %p199_p1 }
   0xb   :  { %181 = vmatprep.subr.bf16.mxu0 %v180_v11 }
   0xc   :  { %p202_p4 = pnand %p201_p3, %p195_p0 }
   0xe   :  { %183 = vmatpush3.bf16.msra.mxu0 %v180_v11 }
   0xf   :  { %185 = vmatprep.subr.bf16.mxu0 %v184_v14 }
  0x12   :  { %187 = vmatpush3.bf16.msra.mxu0 %v184_v14 }
  0x81   :  { %v18_v17 = vpop.permute.xlu0 %17 }
  0x82   :  { %vm22_vm1 = vcmp.eq.s32.totalorder %v18_v17, %v15_v16 }
  0x83   :  { %v139_v19 = vsel %vm22_vm1, 1.0, %v219_v18 }
  0x84   :  { %169 = vmatprep.mubr.msk.f32.mxu0 %vm36_vm0, %v139_v19 }
  0x85   :  { %v21_v20 = vpop.permute.xlu0 %20 }
  0x86   :  { %vm23_vm2 = vcmp.eq.s32.totalorder %v21_v20, %v15_v16 }
  0x87   :  { %v140_v21 = vsel %vm23_vm2, 1.0, %v219_v18 }
  0x88   :  { %170 = vmatmul.mubr.msk.f32.vlgmr.msra.gmra.mrb[0].mxu0 %vm36_vm0, %v140_v21 }
 0x15b   :  { %v171_v22 = vpop.f32.mrb[0].mxu0 }
 0x15c   :  { %v119_v23 = vmul.f32 5.656854, %v171_v22  ;;  %v109_v24 = vpop.f32.mrb[1].mxu0 }
 0x15d   :  { %v118_v25 = vmul.f32 5.656854, %v109_v24 }
 0x15e   :  { %122 = vst.msk [vmem:[#allocation2 + $0x8] sm:$0xff] %vm120_vm3, %v119_v23 }
 0x15f   :  { %121 = vst.msk [vmem:[#allocation2] sm:$0xff] %vm120_vm3, %v118_v25 }
 0x160   :  { %205 = shalt.err (!%p202_p4)
}
 0x161   :  { %s206_s4 = scalar_lea.hbm %s282_s2, 256 }
 0x162   :  { %p207_p5 = scmp.ne.s32.totalorder %s282_s2, %s206_s4  ;;  %p210_p6 = scmp.lt.u32.totalorder %s206_s4, %s282_s2 }
 0x164   :  { %p212_p7 = pnand %p210_p6, %p207_p5 }
 0x166   :  { %215 = shalt.err (!%p212_p7)
}
 0x167   :  { %s221_s9 = smov 128   ;;  %s222_s10 = smov 8  }
 0x168   :  { %134 = dma.vmem_to_hbm [thread:$0]  %s129_s1, 256, %s282_s2, [#allocation3], %s221_s9, %s221_s9, %s222_s10  }
 0x169   :  { %216 = dma.done.wait [#allocation3], 256  }
 0x16a   :  { %217 = vsyncadd [#allocation3], 4294967040 }
 0x16b   :  { %138 = vsyncpa [#allocation3], 1 }

</bundles_post_ra>
